<compile_context>
chip_gen: v5e
topology: v5e:2x2
jax: 0.10.0
libtpu: 0.0.40
codegen_flags: <defaults>
</compile_context>

<pallas_src>
import functools

import jax
import jax.numpy as jnp
from jax import lax
from jax.experimental import pallas as pl
from jax.experimental.pallas import tpu as pltpu


def _cdiv(a, b):
    return (a + b - 1) // b


def _round_up(a, b):
    return _cdiv(a, b) * b


def _conv1d_same_kernel(x_ref, xh_ref, w_ref, b_ref, o_ref, slab_ref, *,
                        K, stride, tile_l, groups, cin_g, cout_g, c_in):
    """One (batch, L-tile) grid step.

    x_ref   : (tile_l, stride*c_in)  phase-packed rows (row r holds `stride` original rows)
    xh_ref  : (halo,   stride*c_in)  rows immediately after the main block (halo)
    w_ref   : (groups, K*cin_g, cout_g)
    b_ref   : (1, C_out) float32
    o_ref   : (tile_l, C_out)
    slab_ref: (tile_l, K*cin_g) VMEM scratch for the im2col slab (reused per group)
    """
    # Sublane-axis concat of two 8-row-aligned blocks: main rows + halo rows.
    x_full = jnp.concatenate([x_ref[...], xh_ref[...]], axis=0)

    for g in range(groups):                       # static unroll (groups known at trace)
        # Assemble the im2col slab with unit-stride slices only.
        for k in range(K):                        # static unroll over taps
            j = k // stride                       # row offset within phase-packed rows
            s = k % stride                        # phase -> lane offset
            c0 = s * c_in + g * cin_g
            slab_ref[:, k * cin_g:(k + 1) * cin_g] = x_full[j:j + tile_l, c0:c0 + cin_g]
        # One MXU matmul per group: contraction width K*cin_g, f32 accumulation.
        y = jnp.dot(slab_ref[...], w_ref[g], preferred_element_type=jnp.float32)
        if groups == 1:
            o_ref[...] = (y + b_ref[...]).astype(o_ref.dtype)     # lane-dense full store
        else:
            # TODO(synk): for groups > 1 with small cout_g this is a masked partial store;
            # a group grid axis + padded C_out would make it lane-dense.
            o_ref[:, g * cout_g:(g + 1) * cout_g] = (
                y + b_ref[:, g * cout_g:(g + 1) * cout_g]).astype(o_ref.dtype)


def my_conv1d_pad_same(x, weight, bias, *, stride, groups=1, tile_l=None,
                       compute_dtype=None):
    """x: (N, C_in, L) PyTorch NCL.  weight: (C_out, C_in//groups, K).  bias: (C_out,)."""
    orig_dtype = x.dtype
    if compute_dtype is not None:                 # optional bf16 path (v6e/v7x); off by default
        x = x.astype(compute_dtype)
        weight = weight.astype(compute_dtype)

    N, C_in, L = x.shape
    C_out, cin_g, K = weight.shape
    assert C_in == cin_g * groups and C_out % groups == 0
    cout_g = C_out // groups

    # SAME padding exactly as in the PyTorch forward().
    L_out = (L + stride - 1) // stride
    p = max(0, (L_out - 1) * stride + K - L)
    pad_left = p // 2

    itemsize = jnp.dtype(x.dtype).itemsize

    # ---- choose L tile (bounded VMEM per step, halo must divide tile) -------
    j_max = (K - 1) // stride                      # halo rows needed in phase-packed space
    halo_r = 8 * max(1, _cdiv(j_max, 8))           # halo block rows, multiple of 8 sublanes
    if tile_l is None:
        budget = 12 * 1024 * 1024                  # per-step budget, conservative for v7x
        row_bytes = 2 * (stride * C_in + C_out) * itemsize + 4 * C_out
        cap = max(halo_r, (budget // row_bytes) // halo_r * halo_r)
        tile_l = min(_round_up(L_out, halo_r), _round_up(512, halo_r), cap)
    tile_l = max(halo_r, _round_up(tile_l, halo_r))   # halo index map needs halo_r | tile_l
    n_tiles = _cdiv(L_out, tile_l)

    # ---- wrapper glue: NLC, zero pad, free phase-packing reshape ------------
    r_tot = n_tiles * tile_l + halo_r
    total_len = r_tot * stride
    pad_right_total = total_len - L - pad_left
    assert pad_right_total >= 0

    x_cl = jnp.transpose(x, (0, 2, 1))                                   # (N, L, C_in)
    x_pad = jnp.pad(x_cl, ((0, 0), (pad_left, pad_right_total), (0, 0)))
    x_r = x_pad.reshape(N, r_tot, stride * C_in)                         # contiguous => free

    # weights: (C_out, cin_g, K) -> (G, K*cin_g, cout_g); row index = k*cin_g + c
    w = jnp.transpose(weight.reshape(groups, cout_g, cin_g, K), (0, 3, 2, 1))
    w = w.reshape(groups, K * cin_g, cout_g)
    b = bias.reshape(1, C_out).astype(jnp.float32)

    kernel = functools.partial(_conv1d_same_kernel, K=K, stride=stride, tile_l=tile_l,
                               groups=groups, cin_g=cin_g, cout_g=cout_g, c_in=C_in)

    blk = tile_l // halo_r
    w_lanes = stride * C_in

    step_bytes = (2 * tile_l * (w_lanes + C_out) * itemsize
                  + 2 * halo_r * w_lanes * itemsize
                  + w.size * jnp.dtype(w.dtype).itemsize
                  + tile_l * K * cin_g * itemsize + 4 * C_out)
    vmem_limit = int(min(48 * 1024 * 1024, max(32 * 1024 * 1024, 4 * step_bytes)))

    cost = pl.CostEstimate(
        flops=2 * N * L_out * C_out * cin_g * K,
        transcendentals=0,
        bytes_accessed=(x.size * itemsize
                        + w.size * jnp.dtype(w.dtype).itemsize
                        + bias.size * 4
                        + N * L_out * C_out * itemsize))

    out_r = pl.pallas_call(
        kernel,
        out_shape=jax.ShapeDtypeStruct((N, n_tiles * tile_l, C_out), x.dtype),
        grid=(N, n_tiles),
        in_specs=[
            pl.BlockSpec((None, tile_l, w_lanes), lambda n, t: (n, t, 0)),            # main rows
            pl.BlockSpec((None, halo_r, w_lanes), lambda n, t: (n, (t + 1) * blk, 0)),  # halo rows
            pl.BlockSpec((groups, K * cin_g, cout_g), lambda n, t: (0, 0, 0)),        # weights
            pl.BlockSpec((1, C_out), lambda n, t: (0, 0)),                            # bias
        ],
        out_specs=pl.BlockSpec((None, tile_l, C_out), lambda n, t: (n, t, 0)),
        scratch_shapes=[pltpu.VMEM((tile_l, K * cin_g), x.dtype)],
        compiler_params=pltpu.CompilerParams(
            dimension_semantics=("parallel", "parallel"),
            vmem_limit_bytes=vmem_limit),
        cost_estimate=cost,
    )(x_r, x_r, w, b)

    out = jnp.transpose(out_r[:, :L_out, :], (0, 2, 1))                  # back to NCL
    return out.astype(orig_dtype)


def _reference(x, weight, bias, stride, groups):
    """Pure-JAX reference with the same SAME-padding arithmetic as the PyTorch forward."""
    L = x.shape[-1]
    K = weight.shape[-1]
    L_out = (L + stride - 1) // stride
    p = max(0, (L_out - 1) * stride + K - L)
    out = lax.conv_general_dilated(
        x, weight, window_strides=(stride,),
        padding=[(p // 2, p - p // 2)],
        dimension_numbers=("NCH", "OIH", "NCH"),
        feature_group_count=groups)
    return out + bias[None, :, None]


if __name__ == "__main__":
    key = jax.random.PRNGKey(0)

    def run_case(N, C_in, L, C_out, K, stride, groups, tile_l=None, seed_off=0):
        kx, kw, kb = jax.random.split(jax.random.fold_in(key, seed_off), 3)
        x = jax.random.normal(kx, (N, C_in, L), dtype=jnp.float32)
        # uniform(-1/sqrt(fan_in), 1/sqrt(fan_in)) like torch.nn.Conv1d default init
        bound = 1.0 / float((C_in // groups) * K) ** 0.5
        weight = jax.random.uniform(kw, (C_out, C_in // groups, K),
                                    minval=-bound, maxval=bound, dtype=jnp.float32)
        bias = jax.random.uniform(kb, (C_out,),
                                  minval=-bound, maxval=bound, dtype=jnp.float32)
        out = jax.block_until_ready(
            my_conv1d_pad_same(x, weight, bias, stride=stride, groups=groups, tile_l=tile_l))
        ref = _reference(x, weight, bias, stride, groups)
        L_out = (L + stride - 1) // stride
        assert out.shape == (N, C_out, L_out), out.shape
        err = float(jnp.max(jnp.abs(out - ref)))
        assert err < 1e-4, err

    # Primary small case consistent with the module's forward.
    run_case(N=2, C_in=4, L=16, C_out=8, K=5, stride=2, groups=1)
    # stride=1 + grouped-conv path.
    run_case(N=2, C_in=4, L=16, C_out=8, K=3, stride=1, groups=2, seed_off=1)
    # multi-tile path: force tile_l < L_out so the halo BlockSpec crosses tile boundaries.
    run_case(N=1, C_in=4, L=37, C_out=8, K=7, stride=3, groups=1, tile_l=8, seed_off=2)

    print("KERNEL_OK")
</pallas_src>

<mosaic_0001>
module attributes {stable_mosaic.version = 11 : i64} {
  func.func @_conv1d_same_kernel(%arg0: i32, %arg1: i32, %arg2: memref<1x8x8xf32, #tpu.memory_space<vmem>>, %arg3: memref<1x8x8xf32, #tpu.memory_space<vmem>>, %arg4: memref<1x20x8xf32, #tpu.memory_space<vmem>>, %arg5: memref<1x8xf32, #tpu.memory_space<vmem>>, %arg6: memref<1x8x8xf32, #tpu.memory_space<vmem>>, %arg7: memref<8x20xf32, #tpu.memory_space<vmem>>) attributes {dimension_semantics = [#tpu.dimension_semantics<parallel>, #tpu.dimension_semantics<parallel>], iteration_bounds = array<i64: 2, 1>, scalar_prefetch = 0 : i64, scratch_operands = 1 : i64, tpu.core_type = #tpu.core_type<tc>, window_params = [{transform_indices = @transform_0, window_bounds = array<i64: 1, 8, 8>}, {transform_indices = @transform_1, window_bounds = array<i64: 1, 8, 8>}, {pipeline_mode = #tpu.pipeline_mode<synchronous>, transform_indices = @transform_2, window_bounds = array<i64: 1, 20, 8>}, {pipeline_mode = #tpu.pipeline_mode<synchronous>, transform_indices = @transform_3, window_bounds = array<i64: 1, 8>}, {transform_indices = @transform_4, window_bounds = array<i64: 1, 8, 8>}]} {
    %c0 = arith.constant 0 : index
    %c0_0 = arith.constant 0 : index
    %c0_1 = arith.constant 0 : index
    %0 = vector.load %arg2[%c0, %c0_0, %c0_1] : memref<1x8x8xf32, #tpu.memory_space<vmem>>, vector<1x8x8xf32>
    %1 = vector.shape_cast %0 : vector<1x8x8xf32> to vector<8x8xf32>
    %c0_2 = arith.constant 0 : index
    %c0_3 = arith.constant 0 : index
    %c0_4 = arith.constant 0 : index
    %2 = vector.load %arg3[%c0_2, %c0_3, %c0_4] : memref<1x8x8xf32, #tpu.memory_space<vmem>>, vector<1x8x8xf32>
    %3 = vector.shape_cast %2 : vector<1x8x8xf32> to vector<8x8xf32>
    %4 = tpu.concatenate %1, %3 in 0 : vector<8x8xf32>, vector<8x8xf32> -> vector<16x8xf32>
    %5 = vector.extract_strided_slice %4 {offsets = [0, 0], sizes = [8, 4], strides = [1, 1]} : vector<16x8xf32> to vector<8x4xf32>
    %c0_5 = arith.constant 0 : index
    %c0_6 = arith.constant 0 : index
    %6 = vector.load %arg7[%c0_5, %c0_6] : memref<8x20xf32, #tpu.memory_space<vmem>>, vector<8x4xf32>
    tpu.vector_store %arg7[%c0_5, %c0_6], %5 {strides = array<i32>} : memref<8x20xf32, #tpu.memory_space<vmem>>, vector<8x4xf32>,
    %7 = vector.extract_strided_slice %4 {offsets = [0, 4], sizes = [8, 4], strides = [1, 1]} : vector<16x8xf32> to vector<8x4xf32>
    %c0_7 = arith.constant 0 : index
    %c4 = arith.constant 4 : index
    %8 = vector.load %arg7[%c0_7, %c4] : memref<8x20xf32, #tpu.memory_space<vmem>>, vector<8x4xf32>
    tpu.vector_store %arg7[%c0_7, %c4], %7 {strides = array<i32>} : memref<8x20xf32, #tpu.memory_space<vmem>>, vector<8x4xf32>,
    %9 = vector.extract_strided_slice %4 {offsets = [1, 0], sizes = [8, 4], strides = [1, 1]} : vector<16x8xf32> to vector<8x4xf32>
    %c0_8 = arith.constant 0 : index
    %c8 = arith.constant 8 : index
    %10 = vector.load %arg7[%c0_8, %c8] : memref<8x20xf32, #tpu.memory_space<vmem>>, vector<8x4xf32>
    tpu.vector_store %arg7[%c0_8, %c8], %9 {strides = array<i32>} : memref<8x20xf32, #tpu.memory_space<vmem>>, vector<8x4xf32>,
    %11 = vector.extract_strided_slice %4 {offsets = [1, 4], sizes = [8, 4], strides = [1, 1]} : vector<16x8xf32> to vector<8x4xf32>
    %c0_9 = arith.constant 0 : index
    %c12 = arith.constant 12 : index
    %12 = vector.load %arg7[%c0_9, %c12] : memref<8x20xf32, #tpu.memory_space<vmem>>, vector<8x4xf32>
    tpu.vector_store %arg7[%c0_9, %c12], %11 {strides = array<i32>} : memref<8x20xf32, #tpu.memory_space<vmem>>, vector<8x4xf32>,
    %13 = vector.extract_strided_slice %4 {offsets = [2, 0], sizes = [8, 4], strides = [1, 1]} : vector<16x8xf32> to vector<8x4xf32>
    %c0_10 = arith.constant 0 : index
    %c16 = arith.constant 16 : index
    %14 = vector.load %arg7[%c0_10, %c16] : memref<8x20xf32, #tpu.memory_space<vmem>>, vector<8x4xf32>
    tpu.vector_store %arg7[%c0_10, %c16], %13 {strides = array<i32>} : memref<8x20xf32, #tpu.memory_space<vmem>>, vector<8x4xf32>,
    %c0_11 = arith.constant 0 : index
    %c0_12 = arith.constant 0 : index
    %15 = vector.load %arg7[%c0_11, %c0_12] : memref<8x20xf32, #tpu.memory_space<vmem>>, vector<8x20xf32>
    %c0_13 = arith.constant 0 : index
    %c0_14 = arith.constant 0 : index
    %c0_15 = arith.constant 0 : index
    %16 = vector.load %arg4[%c0_13, %c0_14, %c0_15] : memref<1x20x8xf32, #tpu.memory_space<vmem>>, vector<1x20x8xf32>
    %17 = vector.shape_cast %16 : vector<1x20x8xf32> to vector<20x8xf32>
    %cst = arith.constant dense<0.000000e+00> : vector<8x8xf32>
    %18 = tpu.matmul %15, %17, %cst {dimension_numbers = #tpu.dot_dimension_numbers<[1], [0], [0], [1], [0, 0, 1, 1], [], []>} : vector<8x20xf32>, vector<20x8xf32>, vector<8x8xf32> -> vector<8x8xf32>
    %c0_16 = arith.constant 0 : index
    %c0_17 = arith.constant 0 : index
    %19 = vector.load %arg5[%c0_16, %c0_17] : memref<1x8xf32, #tpu.memory_space<vmem>>, vector<1x8xf32>
    %20 = vector.broadcast %19 : vector<1x8xf32> to vector<8x8xf32>
    %21 = arith.addf %18, %20 : vector<8x8xf32>
    %c0_18 = arith.constant 0 : index
    %c0_19 = arith.constant 0 : index
    %c0_20 = arith.constant 0 : index
    %22 = vector.load %arg6[%c0_18, %c0_19, %c0_20] : memref<1x8x8xf32, #tpu.memory_space<vmem>>, vector<1x8x8xf32>
    %23 = vector.shape_cast %22 : vector<1x8x8xf32> to vector<8x8xf32>
    %24 = vector.shape_cast %21 : vector<8x8xf32> to vector<1x8x8xf32>
    tpu.vector_store %arg6[%c0_18, %c0_19, %c0_20], %24 {strides = array<i32>} : memref<1x8x8xf32, #tpu.memory_space<vmem>>, vector<1x8x8xf32>,
    return
  }
  func.func @transform_0(%arg0: i32, %arg1: i32) -> (i32, i32, i32) {
    %c0_i32 = arith.constant 0 : i32
    %c0_i32_0 = arith.constant 0 : i32
    return %arg0, %arg1, %c0_i32 : i32, i32, i32
  }
  func.func @transform_1(%arg0: i32, %arg1: i32) -> (i32, i32, i32) {
    %c1_i32 = arith.constant 1 : i32
    %0 = arith.addi %arg1, %c1_i32 : i32
    %c1_i32_0 = arith.constant 1 : i32
    %1 = arith.muli %0, %c1_i32_0 : i32
    %c0_i32 = arith.constant 0 : i32
    %c0_i32_1 = arith.constant 0 : i32
    return %arg0, %1, %c0_i32 : i32, i32, i32
  }
  func.func @transform_2(%arg0: i32, %arg1: i32) -> (i32, i32, i32) {
    %c0_i32 = arith.constant 0 : i32
    %c0_i32_0 = arith.constant 0 : i32
    %c0_i32_1 = arith.constant 0 : i32
    %c0_i32_2 = arith.constant 0 : i32
    return %c0_i32, %c0_i32_0, %c0_i32_1 : i32, i32, i32
  }
  func.func @transform_3(%arg0: i32, %arg1: i32) -> (i32, i32) {
    %c0_i32 = arith.constant 0 : i32
    %c0_i32_0 = arith.constant 0 : i32
    %c0_i32_1 = arith.constant 0 : i32
    return %c0_i32, %c0_i32_0 : i32, i32
  }
  func.func @transform_4(%arg0: i32, %arg1: i32) -> (i32, i32, i32) {
    %c0_i32 = arith.constant 0 : i32
    %c0_i32_0 = arith.constant 0 : i32
    return %arg0, %arg1, %c0_i32 : i32, i32, i32
  }
}

</mosaic_0001>

<bundles_post_ra>
// kernel: tpu_custom_call.1
= control target key start
LH: loop header
LB: loop body
LE: loop exit
PB: predicated region body
PF: predicated region fallthrough
CT: control target
= control target key end

     0   :  { %9 = vsyncpa [#allocation4], 0  ;;  %s735_s0 = inlined_call_operand.vmem [shape: f32[2,16,8], index: 0, kind: input, shape index: {}]   ;;  %s736_s1 = inlined_call_operand.vmem [shape: f32[2,16,8], index: 1, kind: input, shape index: {}]   ;;  %s737_s2 = inlined_call_operand.vmem [shape: f32[1,20,8], index: 2, kind: input, shape index: {}]   ;;  %s738_s3 = inlined_call_operand.vmem [shape: f32[1,8], index: 3, kind: input, shape index: {}]   ;;  %s739_s4 = inlined_call_operand.hbm [shape: f32[2,8,8], index: 4, kind: output, shape index: {}]  }
   0x1   :  { %11 = vsyncpa [#allocation4 + $0x1], 0  ;;  %s623_s15 = smov 0   ;;  %s625_s16 = smov 0  }
   0x2   :  { %s627_s17 = smov 0   ;;  %s629_s18 = smov 0  }
   0x3   :  { %s631_s19 = smov 0   ;;  %s633_s20 = smov 0  }
   0x4 LB: > { %s438_s21 = sadd.s32 4294967295, %s594_s20   ;;  %s439_s22 = sadd.s32 4294967294, %s594_s20   ;;  %s594_s20 = sphi %s633_s20, %s17_s20   ;;  %s590_s19 = sphi %s631_s19, %s746_s19   ;;  %s586_s18 = sphi %s629_s18, %s745_s18   ;;  %s582_s17 = sphi %s627_s17, %s744_s17   ;;  %s578_s16 = sphi %s625_s16, %s743_s16   ;;  %s574_s15 = sphi %s623_s15, %s742_s15  }
   0x5   : > { %s29_s23 = sadd.s32 1, %s590_s19  ;;  %s138_s24 = sadd.s32 1, %s582_s17 }
   0x6   : > { %p31_p0 = scmp.ge.s32.totalorder %s29_s23, 2  ;;  %p148_p1 = scmp.ne.s32.totalorder %s582_s17, %s578_s16 }
   0x7   : > { %p149_p2 = scmp.eq.s32.totalorder %s438_s21, 1  ;;  %p154_p3 = scmp.ne.s32.totalorder %s578_s16, %s574_s15 }
   0x8   : > { %s748_s23 = smov (%p31_p0, %s29_s23), 0  ;;  %p155_p5 = scmp.eq.s32.totalorder %s439_s22, 1 }
   0x9   : > { %p663_p4 = por %p149_p2, %p148_p1  ;;  %s133_s26 = ssub.s32 %s590_s19, %s748_s23 }
   0xa   : > { %p442_p6 = scmp.ge.s32.totalorder %s594_s20, 1  ;;  %p136_p7 = scmp.eq.s32.totalorder %s133_s26, 0 }
   0xb   : > { %p670_p8 = por %p155_p5, %p154_p3  ;;  %p203_p9 = scmp.lt.s32.totalorder %s594_s20, 3 }
   0xc   : > { %s676_s28 = scalar_select %p136_p7, %s582_s17, %s138_s24  }
   0xd   : > { %p204_p10 = pnand %p442_p6, %p203_p9 }
   0xe   : > { %p241_p11 = scmp.lt.s32.totalorder (!%p204_p10), %s586_s18, 1  ;;  %s596_s9 = smov (!%p204_p10), 8  }
   0xf   : > { %207 = sbr.rel (%p204_p10) target bundleno = 289 (0x121), region = 36  ;;  %s597_s10 = smov (!%p204_p10), 16  }
  0x10   : > { %s451_s6 = sshll.u32 (!%p204_p10), %s586_s18, 3 }
  0x14   : > { %s242_s29 = scalar_select %p241_p11, %s586_s18, 1  ;;  %vm261_vm0 = vcmask 31744   ;;  %vm263_vm1 = vcmask 64544   ;;  %v294_v2 = vld [vmem:[%s737_s2 + $0x10] sm:$0xf]  ;;  %vm303_vm2 = vcmask 1043456  }
  0x15   : > { %v293_v3 = vld [vmem:[%s737_s2 + $0x8] sm:$0xff]  ;;  %448 = vmatpush.msk.msra.mxu0 %vm303_vm2, %v294_v2  ;;  %v292_v4 = vld [vmem:[%s737_s2] sm:$0xff]  ;;  %vm273_vm3 = vcmask 97345   ;;  %vm277_vm4 = vcmask 130145   ;;  %vm287_vm5 = vcmask 162946   ;;  %vm275_vm6 = vcmask 90176  }
  0x16   : > { %s454_s30 = sshll.u32 %s242_s29, 4  ;;  %vm279_vm7 = vcmask 122976   ;;  %vm289_vm8 = vcmask 156800   ;;  %vm299_vm9 = vcmask 162816   ;;  %v515_v10 = vld [vmem:[%s738_s3] ss:$0 sm:$0xff] }
  0x17   : > { %s248_s7 = scalar_lea.vmem %s735_s0, %s454_s30  ;;  %s456_s8 = sadd.s32 8, %s454_s30  ;;  %321 = vmatpush.msra.mxu0 %v293_v3  ;;  %vm327_vm10 = vcmask 64512  }
  0x18   : > { %v259_v0 = vld [vmem:[%s248_s7] sm:$0xff]  ;;  %s257_s13 = scalar_lea.vmem %s736_s1, %s456_s8  ;;  %s238_s30 = sand.u32 1, %s578_s16  }
  0x19   : > { %267 = vrot.lane.b32.xlu0 %v259_v0, %s596_s9  ;;  %281 = vrot.lane.b32.xlu1 %v259_v0, %s597_s10  ;;  %262 = vst.msk [vmem:[#allocation2] sm:$0xff] %vm261_vm0, %v259_v0  ;;  %v260_v1 = vld [vmem:[%s257_s13] sm:$0xff]  ;;  %s443_s5 = sshll.u32 %s238_s30, 3  ;;  %s330_s21 = scalar_lea.sflag [#allocation4], %s238_s30 }
  0x1a   : > { %264 = vst.msk [vmem:[#allocation2] sm:$0xff] %vm263_vm1, %v259_v0  ;;  %322 = vmatpush.msra.mxu0 %v292_v4  ;;  %s240_s12 = scalar_lea.vmem [#allocation3], %s443_s5  ;;  %s536_s29 = scalar_lea.hbm %s739_s4, 16 }
  0x1b   : > { %s343_s13 = sshll.u32 %s240_s12, 4  ;;  %s344_s13 = int_to_ptr.vmem [resolvable:$true] %s343_s13 }
  0x21   : > { %269 = vrot.lane.b32.xlu0 %v260_v1, %s596_s9  ;;  %283 = vrot.lane.b32.xlu1 %v260_v1, %s597_s10  ;;  %s341_s9 = scalar_lea.hbm %s739_s4, %s451_s6 }
  0x22   : > { %s345_s14 = sshll.u32 %s341_s9, 4  ;;  %s346_s14 = int_to_ptr.hbm [resolvable:$true] %s345_s14 }
  0x23   : > { %s530_s18 = sshra.s32 %s346_s14, 4  ;;  %s531_s18 = int_to_ptr.hbm [resolvable:$true] %s530_s18 }
  0x24   : > { %s532_s22 = scalar_lea.hbm %s531_s18, 8  ;;  %p537_p1 = scmp.lt.s32.totalorder %s531_s18, %s739_s4 }
  0x25   : > { %p533_p12 = scmp.ne.s32.totalorder %s531_s18, %s532_s22  ;;  %p538_p2 = scmp.lt.s32.totalorder %s536_s29, %s532_s22 }
  0x27   : > { %p534_p13 = pnand %p533_p12, %p663_p4  ;;  %p539_p3 = por %p538_p2, %p537_p1 }
  0x29   : > { %p535_p0 = pneg %p534_p13 }
  0x2b   : > { %p540_p5 = pnand %p539_p3, %p535_p0 }
  0x8b   : > { %v268_v5 = vpop.permute.xlu0 %267  ;;  %v282_v6 = vpop.permute.xlu1 %281 }
  0x8c   : > { %274 = vst.msk [vmem:[#allocation2 - $0x1] sm:$0xfe] %vm273_vm3, %v268_v5 }
  0x8d   : > { %278 = vst.msk [vmem:[#allocation2 - $0x1] sm:$0xfe] %vm277_vm4, %v268_v5 }
  0x8e   : > { %288 = vst.msk [vmem:[#allocation2 - $0x2] sm:$0xfc] %vm287_vm5, %v282_v6 }
  0x93   : > { %v270_v7 = vpop.permute.xlu0 %269  ;;  %v284_v8 = vpop.permute.xlu1 %283 }
  0x94   : > { %276 = vst.msk [vmem:[#allocation2 + $0x7] sm:$0x1] %vm275_vm6, %v270_v7 }
  0x95   : > { %280 = vst.msk [vmem:[#allocation2 + $0x7] sm:$0x1] %vm279_vm7, %v270_v7 }
  0x96   : > { %290 = vst.msk [vmem:[#allocation2 + $0x6] sm:$0x3] %vm289_vm8, %v284_v8 }
  0x9d   : > { %v291_v9 = vld [vmem:[#allocation2] sm:$0xff] }
  0x9e   : > { %449 = vmatmul.msk.f32.vlgmr.msra.gmra.mxu0 %vm299_vm9, %v291_v9 }
 0x11b   : > { %v324_v11 = vpop.f32.mrf.mxu0 }
 0x11c   : > { %v325_v12 = vadd.f32 %v515_v10, %v324_v11 }
 0x11e   : > { %328 = vst.msk [vmem:[%s240_s12] sm:$0xff] %vm327_vm10, %v325_v12 }
 0x11f   : > { %543 = shalt.err (!%p540_p5)
}
 0x120   : > { %458 = dma.vmem_to_hbm [thread:$0]  (%p663_p4), %s344_s13, 128, %s346_s14, %s330_s21  }
 0x121 PF: > { %p464_p6 = scmp.ge.s32.totalorder %s594_s20, 2  ;;  %s357_s30 = sand.u32 1, %s574_s15  }
 0x122   : > { %s358_s7 = scalar_lea.sflag [#allocation4], %s357_s30 }
 0x123   : > { %p461_p7 = pnand %p464_p6, %p670_p8 }
 0x125   : > { %p462_p9 = pneg %p461_p7 }
 0x127   : > { %569 = dma.done.wait (%p462_p9), %s358_s7, 128  }
 0x128   : > { %571 = vsyncadd (%p462_p9), %s358_s7, 4294967168  ;;  %s17_s20 = sadd.s32 1, %s594_s20   ;;  %s742_s15 = smov %s578_s16 }
 0x129   : > { %p14_p10 = scmp.ge.s32.totalorder %s17_s20, 4   ;;  %s743_s16 = smov %s582_s17 }
 0x12a   : > { %s744_s17 = smov %s676_s28  ;;  %s745_s18 = smov %s590_s19 }
 0x12b   : > { %s746_s19 = smov %s748_s23  ;;  %16 = sbr.rel (!%p14_p10) target bundleno = 4 (0x4), region = 74 }
 0x130   :  { %364 = vsyncpa [#allocation4], 1 }
 0x131   :  { %366 = vsyncpa [#allocation4 + $0x1], 1 }

</bundles_post_ra>
